<compile_context>
chip_gen: v7x
topology: tpu7x:2x2x1
jax: 0.10.0
libtpu: 0.0.40
codegen_flags: <defaults>
</compile_context>

<pallas_src>
import functools
import math

import jax
import jax.numpy as jnp
from jax import lax
from jax.experimental import pallas as pl
from jax.experimental.pallas import tpu as pltpu


# ---------------------------------------------------------------------------
# Hardware / sizing helpers
# ---------------------------------------------------------------------------
def _tpu_vmem_bytes():
    try:
        v = getattr(pltpu.get_tpu_info(), "vmem_capacity_bytes", 0)
        if v and int(v) > 0:
            return int(v)
    except Exception:
        pass
    return 64 << 20          # conservative fallback (v7x per-core VMEM)


def _vmem_limit(working_set_bytes):
    """Scoped-VMEM limit from the actual per-step working set (+ headroom for
    Mosaic internal scratch), clamped to 75% of physical VMEM."""
    cap = int(_tpu_vmem_bytes() * 3 // 4)
    want = int(working_set_bytes) * 3 + (8 << 20)
    return max(min(want, cap), 32 << 20)


_SUB_ALIGNS = (512, 256, 128, 64, 32, 16, 8)   # second-to-last (sublane) dims
_LANE_ALIGNS = (512, 256, 128)                 # last (lane) dims


def _pick_tile(dim, target, aligns):
    """Largest tile <= target that divides `dim` and is a multiple of one of
    `aligns` (largest alignment preferred).  Falls back to the full dimension,
    which is always a legal block extent."""
    if dim <= target:
        return dim
    for a in aligns:
        t = (target // a) * a
        while t >= a:
            if dim % t == 0:
                return t
            t -= a
    return dim


# ---------------------------------------------------------------------------
# Tiled linear:  y = x @ W^T + b      (x: (M, K), wt = W^T: (K, N), b: (1, N))
# Operands arrive pre-cast to the compute dtype; accumulation is f32.
# ---------------------------------------------------------------------------
def _linear_kernel_acc(x_ref, wt_ref, b_ref, o_ref, acc_ref):
    k = pl.program_id(2)

    @pl.when(k == 0)
    def _init():
        acc_ref[...] = jnp.zeros_like(acc_ref)

    acc_ref[...] += jnp.dot(x_ref[...], wt_ref[...],
                            preferred_element_type=jnp.float32)

    @pl.when(k == pl.num_programs(2) - 1)
    def _finalize():
        o_ref[...] = (acc_ref[...] + b_ref[...]).astype(o_ref.dtype)


def _linear_kernel_single(x_ref, wt_ref, b_ref, o_ref):
    # Single K step: no zero-init / += / scratch round-trip (review item).
    o_ref[...] = (jnp.dot(x_ref[...], wt_ref[...],
                          preferred_element_type=jnp.float32)
                  + b_ref[...]).astype(o_ref.dtype)


def pallas_linear(x2d, wt, b, out_dtype):
    m, kdim = x2d.shape
    n = wt.shape[1]
    tm = _pick_tile(m, 512, _SUB_ALIGNS)
    tk = _pick_tile(kdim, 512, _LANE_ALIGNS)
    tn = _pick_tile(n, 512, _LANE_ALIGNS)
    n_k = kdim // tk
    grid = (m // tm, n // tn, n_k)

    ib = x2d.dtype.itemsize
    ob = jnp.dtype(out_dtype).itemsize
    ws = (2 * (tm * tk + tk * tn) * ib + 2 * tm * tn * ob
          + tm * tn * 4 + 2 * tn * 4)

    if n_k == 1:
        kernel, scratch = _linear_kernel_single, []
    else:
        kernel, scratch = _linear_kernel_acc, [pltpu.VMEM((tm, tn), jnp.float32)]

    return pl.pallas_call(
        kernel,
        out_shape=jax.ShapeDtypeStruct((m, n), out_dtype),
        grid_spec=pltpu.PrefetchScalarGridSpec(
            num_scalar_prefetch=0,
            grid=grid,
            in_specs=[
                pl.BlockSpec((tm, tk), lambda i, j, k: (i, k)),
                pl.BlockSpec((tk, tn), lambda i, j, k: (k, j)),
                pl.BlockSpec((1, tn), lambda i, j, k: (0, j)),
            ],
            out_specs=pl.BlockSpec((tm, tn), lambda i, j, k: (i, j)),
            scratch_shapes=scratch),
        compiler_params=pltpu.CompilerParams(
            dimension_semantics=("parallel", "parallel", "arbitrary"),
            vmem_limit_bytes=_vmem_limit(ws)),
    )(x2d, wt, b)


# ---------------------------------------------------------------------------
# Flash attention: grid = (B, H, Lq/tq, Lkv/tkv), online softmax over the
# innermost K/V axis.  1/sqrt(d_head) is already folded into q upstream.
# ---------------------------------------------------------------------------
def _flash_attn_kernel(q_ref, k_ref, v_ref, o_ref, m_ref, l_ref, acc_ref, *,
                       approx):
    kv = pl.program_id(3)

    @pl.when(kv == 0)
    def _init():
        m_ref[...] = jnp.full_like(m_ref, -jnp.inf)
        l_ref[...] = jnp.zeros_like(l_ref)
        acc_ref[...] = jnp.zeros_like(acc_ref)

    q = q_ref[0, 0]                               # (tq, dh)
    k = k_ref[0, 0]                               # (tkv, dh)
    v = v_ref[0, 0]                               # (tkv, dh)

    # s = q @ k^T : contract last dims directly (no k.T relayout), f32 result.
    s = lax.dot_general(q, k, (((1,), (1,)), ((), ())),
                        preferred_element_type=jnp.float32)        # (tq, tkv)

    # Softmax element-wise math stays f32 (v5e VPU/EUP have no bf16).
    m_prev = m_ref[...]
    m_new = jnp.maximum(m_prev, jnp.max(s, axis=-1, keepdims=True))
    alpha = jnp.exp(m_prev - m_new)
    p = jnp.exp(s - m_new)
    l_ref[...] = alpha * l_ref[...] + jnp.sum(p, axis=-1, keepdims=True)
    acc_ref[...] = alpha * acc_ref[...] + jnp.dot(
        p.astype(v.dtype), v, preferred_element_type=jnp.float32)
    m_ref[...] = m_new

    @pl.when(kv == pl.num_programs(3) - 1)
    def _finalize():
        inv = pl.reciprocal(l_ref[...], approx=approx)   # l >= 1, approx is safe
        o_ref[0, 0] = (acc_ref[...] * inv).astype(o_ref.dtype)


def pallas_flash_attention(q, k, v, out_dtype, approx_recip):
    """q: (B, H, Lq, dh); k, v: (B, H, Lkv, dh) -> (B, H, Lq, dh)."""
    B, H, Lq, dh = q.shape
    Lkv = k.shape[2]
    tq = _pick_tile(Lq, 256, _SUB_ALIGNS)
    tkv = _pick_tile(Lkv, 512, _SUB_ALIGNS)
    grid = (B, H, Lq // tq, Lkv // tkv)

    ab = q.dtype.itemsize
    ws = (2 * (tq * dh + 2 * tkv * dh) * ab
          + 2 * tq * dh * jnp.dtype(out_dtype).itemsize
          + tq * dh * 4 + 4 * tq * 4 + 3 * tq * tkv * 4)

    q_spec = pl.BlockSpec((1, 1, tq, dh), lambda b, h, i, j: (b, h, i, 0))
    kv_spec = pl.BlockSpec((1, 1, tkv, dh), lambda b, h, i, j: (b, h, j, 0))
    o_spec = pl.BlockSpec((1, 1, tq, dh), lambda b, h, i, j: (b, h, i, 0))

    kernel = functools.partial(_flash_attn_kernel, approx=approx_recip)
    return pl.pallas_call(
        kernel,
        out_shape=jax.ShapeDtypeStruct((B, H, Lq, dh), out_dtype),
        grid_spec=pltpu.PrefetchScalarGridSpec(
            num_scalar_prefetch=0,
            grid=grid,
            in_specs=[q_spec, kv_spec, kv_spec],
            out_specs=o_spec,
            scratch_shapes=[pltpu.VMEM((tq, 1), jnp.float32),
                            pltpu.VMEM((tq, 1), jnp.float32),
                            pltpu.VMEM((tq, dh), jnp.float32)]),
        compiler_params=pltpu.CompilerParams(
            dimension_semantics=("parallel", "parallel", "parallel",
                                 "arbitrary"),
            vmem_limit_bytes=_vmem_limit(ws)),
    )(q, k, v)


# ---------------------------------------------------------------------------
# Head merge ("concat") fused into the output projection:
#   out[b, l, :] = sum_h x[b, h, l, :] @ wt_hd[h] + bias
# so attention output in (B, H, L, dh) is consumed directly (no HBM transpose).
# ---------------------------------------------------------------------------
def _merge_linear_kernel(x_ref, wt_ref, b_ref, o_ref, acc_ref):
    h = pl.program_id(3)

    @pl.when(h == 0)
    def _init():
        acc_ref[...] = jnp.zeros_like(acc_ref)

    acc_ref[...] += jnp.dot(x_ref[0, 0], wt_ref[0],
                            preferred_element_type=jnp.float32)

    @pl.when(h == pl.num_programs(3) - 1)
    def _finalize():
        o_ref[0] = (acc_ref[...] + b_ref[...]).astype(o_ref.dtype)


def pallas_merge_linear(x, wt_hd, b, out_dtype):
    """x: (B, H, L, dh); wt_hd: (H, dh, D); b: (1, D) -> (B, L, D)."""
    B, H, L, dh = x.shape
    D = wt_hd.shape[2]
    tm = _pick_tile(L, 512, _SUB_ALIGNS)
    tn = _pick_tile(D, 512, _LANE_ALIGNS)
    grid = (B, L // tm, D // tn, H)

    ib = x.dtype.itemsize
    ob = jnp.dtype(out_dtype).itemsize
    ws = 2 * (tm * dh + dh * tn) * ib + 2 * tm * tn * ob + tm * tn * 4 + 2 * tn * 4

    return pl.pallas_call(
        _merge_linear_kernel,
        out_shape=jax.ShapeDtypeStruct((B, L, D), out_dtype),
        grid_spec=pltpu.PrefetchScalarGridSpec(
            num_scalar_prefetch=0,
            grid=grid,
            in_specs=[
                pl.BlockSpec((1, 1, tm, dh), lambda b, i, j, h: (b, h, i, 0)),
                pl.BlockSpec((1, dh, tn), lambda b, i, j, h: (h, 0, j)),
                pl.BlockSpec((1, tn), lambda b, i, j, h: (0, j)),
            ],
            out_specs=pl.BlockSpec((1, tm, tn), lambda b, i, j, h: (b, i, j)),
            scratch_shapes=[pltpu.VMEM((tm, tn), jnp.float32)]),
        compiler_params=pltpu.CompilerParams(
            dimension_semantics=("parallel", "parallel", "parallel",
                                 "arbitrary"),
            vmem_limit_bytes=_vmem_limit(ws)),
    )(x, wt_hd, b)


# ---------------------------------------------------------------------------
# Parameters
# ---------------------------------------------------------------------------
def init_mha_params(key, d_model):
    """Module-faithful params (nn.Linear default init), stored as
    (W^T: (d_in, d_out), b: (1, d_out)) in f32."""
    ks = jax.random.split(key, 8)
    bound = 1.0 / math.sqrt(d_model)

    def lin(kw, kb):
        w = jax.random.uniform(kw, (d_model, d_model), jnp.float32, -bound, bound)
        b = jax.random.uniform(kb, (d_model,), jnp.float32, -bound, bound)
        return w.T, b.reshape(1, d_model)

    return {"w_q": lin(ks[0], ks[1]), "w_k": lin(ks[2], ks[3]),
            "w_v": lin(ks[4], ks[5]), "w_concat": lin(ks[6], ks[7])}


def prepare_mha_params(params, n_head, compute_dtype=jnp.bfloat16):
    """One-time packing of module params into kernel operands:
      * 1/sqrt(d_head) folded into the q projection (weights + bias),
      * fused (D, 3D) W_qkv^T for the self-attention fast path,
      * W_concat^T reshaped to (H, dh, D) so the head merge happens inside the
        output-projection contraction,
      * matmul operands cast to the compute dtype; biases stay f32."""
    wq_t, b_q = params["w_q"]
    wk_t, b_k = params["w_k"]
    wv_t, b_v = params["w_v"]
    wc_t, b_c = params["w_concat"]
    d_model = wq_t.shape[0]
    assert d_model % n_head == 0
    d_head = d_model // n_head
    scale = 1.0 / math.sqrt(d_head)

    act = jnp.bfloat16 if compute_dtype == jnp.bfloat16 else jnp.float32
    wq_s, bq_s = wq_t * scale, b_q * scale
    return {
        "n_head": n_head, "d_head": d_head, "compute_dtype": act,
        "wq_t": wq_s.astype(act), "b_q": bq_s.astype(jnp.float32),
        "wk_t": wk_t.astype(act), "b_k": b_k.astype(jnp.float32),
        "wv_t": wv_t.astype(act), "b_v": b_v.astype(jnp.float32),
        "wqkv_t": jnp.concatenate([wq_s, wk_t, wv_t], axis=1).astype(act),
        "b_qkv": jnp.concatenate([bq_s, b_k, b_v], axis=1).astype(jnp.float32),
        "wc_hd": wc_t.reshape(n_head, d_head, d_model).astype(act),
        "b_c": b_c.astype(jnp.float32),
    }


# ---------------------------------------------------------------------------
# MultiHeadAttention forward
# ---------------------------------------------------------------------------
def multi_head_attention(prep, q, k, v):
    """q: (B, Lq, d_model); k, v: (B, Lkv, d_model) -> (B, Lq, d_model)."""
    B, Lq, D = q.shape
    H, dh = prep["n_head"], prep["d_head"]
    act = prep["compute_dtype"]
    out_dtype = q.dtype
    approx = act != jnp.float32

    def to_heads(y2d, length):
        # (B*length, D) -> (B, H, length, dh): heads become a grid/DMA axis of
        # the attention kernel (clean (tq, dh) tiles, no intra-vreg slicing).
        # TODO(synk): fold this split into the projection's output BlockSpec to
        # save one HBM round-trip of the activations.
        return y2d.reshape(B, length, H, dh).transpose(0, 2, 1, 3)

    if q is k and k is v:
        # Self-attention fast path: one fused QKV matmul, x read from HBM once.
        x2d = q.reshape(B * Lq, D).astype(act)
        qkv = pallas_linear(x2d, prep["wqkv_t"], prep["b_qkv"], out_dtype=act)
        qkv = qkv.reshape(B, Lq, 3, H, dh).transpose(2, 0, 3, 1, 4)
        q_h, k_h, v_h = qkv[0], qkv[1], qkv[2]
    else:
        Lkv = k.shape[1]
        q_h = to_heads(pallas_linear(q.reshape(B * Lq, D).astype(act),
                                     prep["wq_t"], prep["b_q"], out_dtype=act),
                       Lq)
        k_h = to_heads(pallas_linear(k.reshape(B * Lkv, D).astype(act),
                                     prep["wk_t"], prep["b_k"], out_dtype=act),
                       Lkv)
        v_h = to_heads(pallas_linear(v.reshape(B * Lkv, D).astype(act),
                                     prep["wv_t"], prep["b_v"], out_dtype=act),
                       Lkv)

    attn = pallas_flash_attention(q_h, k_h, v_h, out_dtype=act,
                                  approx_recip=approx)
    return pallas_merge_linear(attn, prep["wc_hd"], prep["b_c"],
                               out_dtype=out_dtype)


# ---------------------------------------------------------------------------
# Pure-JAX f32 reference (matches the PyTorch module semantics)
# ---------------------------------------------------------------------------
def mha_reference(params, q, k, v, n_head):
    B, Lq, D = q.shape
    Lkv = k.shape[1]
    dh = D // n_head
    hi = jax.lax.Precision.HIGHEST

    def lin(x, name):
        wt, b = params[name]
        return jnp.dot(x, wt, precision=hi) + b

    def split(t, length):
        return t.reshape(B, length, n_head, dh).transpose(0, 2, 1, 3)

    qh = split(lin(q, "w_q"), Lq)
    kh = split(lin(k, "w_k"), Lkv)
    vh = split(lin(v, "w_v"), Lkv)
    score = jnp.einsum("bhld,bhmd->bhlm", qh, kh, precision=hi) / math.sqrt(dh)
    score = jax.nn.softmax(score, axis=-1)
    out = jnp.einsum("bhlm,bhmd->bhld", score, vh, precision=hi)
    out = out.transpose(0, 2, 1, 3).reshape(B, Lq, D)
    return lin(out, "w_concat")


if __name__ == "__main__":
    B, L, D, H = 2, 8, 32, 4

    key = jax.random.PRNGKey(0)
    kq, kk, kv, kp = jax.random.split(key, 4)
    q = jax.random.normal(kq, (B, L, D), jnp.float32)
    k = jax.random.normal(kk, (B, L, D), jnp.float32)
    v = jax.random.normal(kv, (B, L, D), jnp.float32)
    params = init_mha_params(kp, D)

    def rel_err(a, b):
        a = a.astype(jnp.float32)
        return float(jnp.linalg.norm(a - b) / (jnp.linalg.norm(b) + 1e-12))

    # Cross-attention (distinct q/k/v): f32 verification path + bf16 perf path.
    ref = mha_reference(params, q, k, v, H)
    prep_f32 = prepare_mha_params(params, H, compute_dtype=jnp.float32)
    prep_bf16 = prepare_mha_params(params, H, compute_dtype=jnp.bfloat16)

    out_f32 = jax.block_until_ready(multi_head_attention(prep_f32, q, k, v))
    out_bf16 = jax.block_until_ready(multi_head_attention(prep_bf16, q, k, v))
    assert out_f32.shape == (B, L, D)
    assert out_bf16.shape == (B, L, D)
    e32 = rel_err(out_f32, ref)
    e16 = rel_err(out_bf16, ref)
    assert e32 < 1e-3, f"f32-path mismatch vs reference: rel_err={e32}"
    assert e16 < 2e-2, f"bf16-path mismatch vs reference: rel_err={e16}"

    # Self-attention (q is k is v): exercises the fused QKV projection path.
    ref_self = mha_reference(params, q, q, q, H)
    out_self = jax.block_until_ready(multi_head_attention(prep_bf16, q, q, q))
    e_self = rel_err(out_self, ref_self)
    assert e_self < 2e-2, f"fused self-attention path mismatch: rel_err={e_self}"

    print("KERNEL_OK")
</pallas_src>

<mosaic_0001>
module attributes {stable_mosaic.version = 11 : i64} {
  func.func @_linear_kernel_single(%arg0: i32, %arg1: i32, %arg2: i32, %arg3: memref<16x32xf32, #tpu.memory_space<vmem>>, %arg4: memref<32x32xf32, #tpu.memory_space<vmem>>, %arg5: memref<1x32xf32, #tpu.memory_space<vmem>>, %arg6: memref<16x32xf32, #tpu.memory_space<vmem>>) attributes {dimension_semantics = [#tpu.dimension_semantics<parallel>, #tpu.dimension_semantics<parallel>, #tpu.dimension_semantics<arbitrary>], iteration_bounds = array<i64: 1, 1, 1>, scalar_prefetch = 0 : i64, scratch_operands = 0 : i64, tpu.core_type = #tpu.core_type<tc>, window_params = [{transform_indices = @transform_0, window_bounds = array<i64: 16, 32>}, {transform_indices = @transform_1, window_bounds = array<i64: 32, 32>}, {transform_indices = @transform_2, window_bounds = array<i64: 1, 32>}, {transform_indices = @transform_3, window_bounds = array<i64: 16, 32>}]} {
    %c0 = arith.constant 0 : index
    %c0_0 = arith.constant 0 : index
    %0 = vector.load %arg3[%c0, %c0_0] : memref<16x32xf32, #tpu.memory_space<vmem>>, vector<16x32xf32>
    %c0_1 = arith.constant 0 : index
    %c0_2 = arith.constant 0 : index
    %1 = vector.load %arg4[%c0_1, %c0_2] : memref<32x32xf32, #tpu.memory_space<vmem>>, vector<32x32xf32>
    %cst = arith.constant dense<0.000000e+00> : vector<16x32xf32>
    %2 = tpu.matmul %0, %1, %cst {dimension_numbers = #tpu.dot_dimension_numbers<[1], [0], [0], [1], [0, 0, 1, 1], [], []>} : vector<16x32xf32>, vector<32x32xf32>, vector<16x32xf32> -> vector<16x32xf32>
    %c0_3 = arith.constant 0 : index
    %c0_4 = arith.constant 0 : index
    %3 = vector.load %arg5[%c0_3, %c0_4] : memref<1x32xf32, #tpu.memory_space<vmem>>, vector<1x32xf32>
    %4 = vector.broadcast %3 : vector<1x32xf32> to vector<16x32xf32>
    %5 = arith.addf %2, %4 : vector<16x32xf32>
    %c0_5 = arith.constant 0 : index
    %c0_6 = arith.constant 0 : index
    %6 = vector.load %arg6[%c0_5, %c0_6] : memref<16x32xf32, #tpu.memory_space<vmem>>, vector<16x32xf32>
    tpu.vector_store %arg6[%c0_5, %c0_6], %5 {strides = array<i32>} : memref<16x32xf32, #tpu.memory_space<vmem>>, vector<16x32xf32>,
    return
  }
  func.func @transform_0(%arg0: i32, %arg1: i32, %arg2: i32) -> (i32, i32) {
    %c0_i32 = arith.constant 0 : i32
    return %arg0, %arg2 : i32, i32
  }
  func.func @transform_1(%arg0: i32, %arg1: i32, %arg2: i32) -> (i32, i32) {
    %c0_i32 = arith.constant 0 : i32
    return %arg2, %arg1 : i32, i32
  }
  func.func @transform_2(%arg0: i32, %arg1: i32, %arg2: i32) -> (i32, i32) {
    %c0_i32 = arith.constant 0 : i32
    %c0_i32_0 = arith.constant 0 : i32
    return %c0_i32, %arg1 : i32, i32
  }
  func.func @transform_3(%arg0: i32, %arg1: i32, %arg2: i32) -> (i32, i32) {
    %c0_i32 = arith.constant 0 : i32
    return %arg0, %arg1 : i32, i32
  }
}

</mosaic_0001>

<bundles_post_ra>
// kernel: tpu_custom_call.1
= control target key start
LH: loop header
LB: loop body
LE: loop exit
PB: predicated region body
PF: predicated region fallthrough
CT: control target
= control target key end

     0   :  { %8 = vsyncpa [#allocation3], 0  ;;  %s340_s0 = inlined_call_operand.hbm [shape: f32[16,32], index: 0, kind: input, shape index: {}]   ;;  %s341_s1 = inlined_call_operand.hbm [shape: f32[32,32], index: 1, kind: input, shape index: {}]   ;;  %s342_s2 = inlined_call_operand.vmem [shape: f32[1,32], index: 2, kind: input, shape index: {}]   ;;  %s343_s3 = inlined_call_operand.hbm [shape: f32[16,32], index: 3, kind: output, shape index: {}]  }
   0x1   :  { %9 = vsyncpa [#allocation6], 0 }
   0x2   :  { %10 = vsyncpa [#allocation4], 0  ;;  %s263_s12 = smov [#allocation2]   ;;  %s191_s16 = scalar_lea.hbm %s340_s0, 256 }
   0x3   :  { %s16_s13 = sshll.u32 %s263_s12, 4  ;;  %p192_p0 = scmp.ne.s32.totalorder %s340_s0, %s191_s16  ;;  %s17_s13 = int_to_ptr.vmem [resolvable:$true] %s16_s13 }
   0x4   :  { %p195_p1 = scmp.lt.u32.totalorder %s191_s16, %s340_s0 }
   0x6   :  { %p197_p2 = pnand %p195_p1, %p192_p0 }
   0x8   :  { %200 = shalt.err (!%p197_p2)
}
   0x9   :  { %s201_s21 = scalar_lea.vmem %s17_s13, 256  ;;  %p206_p4 = scmp.lt.s32.totalorder %s17_s13, %s17_s13 }
   0xa   :  { %p202_p3 = scmp.ne.s32.totalorder %s17_s13, %s201_s21  ;;  %p207_p5 = scmp.lt.s32.totalorder %s201_s21, %s201_s21 }
   0xc   :  { %p208_p6 = por %p207_p5, %p206_p4 }
   0xe   :  { %p209_p7 = pnand %p208_p6, %p202_p3 }
  0x10   :  { %212 = shalt.err (!%p209_p7)
}
  0x11   :  { %s264_s22 = smov 128   ;;  %s265_s23 = smov 8  }
  0x12   :  { %22 = dma.hbm_to_vmem [thread:$0]  %s340_s0, 256, %s17_s13, [#allocation3], %s264_s22, %s264_s22, %s265_s23  }
  0x13   :  { %s266_s26 = smov [#allocation5]   ;;  %s213_s30 = scalar_lea.hbm %s341_s1, 512 }
  0x14   :  { %s28_s27 = sshll.u32 %s266_s26, 4  ;;  %p214_p8 = scmp.ne.s32.totalorder %s341_s1, %s213_s30  ;;  %s29_s27 = int_to_ptr.vmem [resolvable:$true] %s28_s27 }
  0x15   :  { %p217_p9 = scmp.lt.u32.totalorder %s213_s30, %s341_s1 }
  0x17   :  { %p219_p10 = pnand %p217_p9, %p214_p8 }
  0x19   :  { %222 = shalt.err (!%p219_p10)
}
  0x1a   :  { %s223_s8 = scalar_lea.vmem %s29_s27, 512  ;;  %p228_p12 = scmp.lt.s32.totalorder %s29_s27, %s29_s27 }
  0x1b   :  { %p224_p11 = scmp.ne.s32.totalorder %s29_s27, %s223_s8  ;;  %p229_p13 = scmp.lt.s32.totalorder %s223_s8, %s223_s8 }
  0x1d   :  { %p230_p0 = por %p229_p13, %p228_p12 }
  0x1f   :  { %p231_p1 = pnand %p230_p0, %p224_p11 }
  0x21   :  { %234 = shalt.err (!%p231_p1)
}
  0x22   :  { %34 = dma.hbm_to_vmem [thread:$0]  %s341_s1, 512, %s29_s27, [#allocation6], %s264_s22, %s264_s22, %s265_s23  }
  0x23   :  { %257 = dma.done.wait [#allocation3], 256  }
  0x24   :  { %258 = vsyncadd [#allocation3], 4294967040 }
  0x25   :  { %259 = dma.done.wait [#allocation6], 512  }
  0x26   :  { %260 = vsyncadd [#allocation6], 4294966784  ;;  %vm56_vm0 = vcmask 261120   ;;  %v45_v0 = vld [vmem:[#allocation5] sm:$0xff]  ;;  %v46_v1 = vld [vmem:[#allocation5 + $0x8] sm:$0xff]  ;;  %s267_s11 = smov [#allocation7]  }
  0x27   :  { %v47_v2 = vld [vmem:[#allocation5 + $0x10] sm:$0xff]  ;;  %v178_v3 = vpack.c.bf16 %v46_v1, %v45_v0  ;;  %v48_v4 = vld [vmem:[#allocation5 + $0x18] sm:$0xff]  ;;  %s145_s12 = sshll.u32 %s267_s11, 4  ;;  %s146_s12 = int_to_ptr.vmem [resolvable:$true] %s145_s12 }
  0x28   :  { %v43_v5 = vld [vmem:[#allocation2] sm:$0xff]  ;;  %v182_v6 = vpack.c.bf16 %v48_v4, %v47_v2  ;;  %v44_v7 = vld [vmem:[#allocation2 + $0x8] sm:$0xff]  ;;  %s235_s13 = scalar_lea.vmem %s146_s12, 256  ;;  %p240_p3 = scmp.lt.s32.totalorder %s146_s12, %s146_s12 }
  0x29   :  { %175 = vmatprep.mubr.msk.f32.mxu0 %vm56_vm0, %v43_v5  ;;  %179 = vmatprep.subr.bf16.mxu0 %v178_v3  ;;  %v158_v8 = vld [vmem:[%s342_s2] ss:$0 sm:$0xff]  ;;  %p236_p2 = scmp.ne.s32.totalorder %s146_s12, %s235_s13  ;;  %p241_p4 = scmp.lt.s32.totalorder %s235_s13, %s235_s13 }
  0x2a   :  { %181 = vmatpush3.bf16.msra.mxu0 %v178_v3 }
  0x2b   :  { %183 = vmatprep.subr.bf16.mxu0 %v182_v6  ;;  %p242_p5 = por %p241_p4, %p240_p3 }
  0x2d   :  { %p243_p6 = pnand %p242_p5, %p236_p2 }
  0x2e   :  { %185 = vmatpush3.bf16.msra.mxu0 %v182_v6 }
  0x31   :  { %176 = vmatmul.mubr.msk.f32.vlgmr.msra.gmra.mrb[0].mxu0 %vm56_vm0, %v44_v7 }
 0x104   :  { %v177_v9 = vpop.f32.mrb[0].mxu0 }
 0x105   :  { %v135_v10 = vadd.f32 %v177_v9, %v158_v8  ;;  %v129_v11 = vpop.f32.mrb[1].mxu0 }
 0x106   :  { %v130_v12 = vadd.f32 %v158_v8, %v129_v11 }
 0x107   :  { %139 = vst.msk [vmem:[#allocation7 + $0x8] sm:$0xff] %vm56_vm0, %v135_v10 }
 0x108   :  { %138 = vst.msk [vmem:[#allocation7] sm:$0xff] %vm56_vm0, %v130_v12 }
 0x109   :  { %246 = shalt.err (!%p243_p6)
}
 0x10a   :  { %s247_s15 = scalar_lea.hbm %s343_s3, 256 }
 0x10b   :  { %p248_p7 = scmp.ne.s32.totalorder %s343_s3, %s247_s15  ;;  %p251_p8 = scmp.lt.u32.totalorder %s247_s15, %s343_s3 }
 0x10d   :  { %p253_p9 = pnand %p251_p8, %p248_p7 }
 0x10f   :  { %256 = shalt.err (!%p253_p9)
}
 0x110   :  { %151 = dma.vmem_to_hbm [thread:$0]  %s146_s12, 256, %s343_s3, [#allocation4], %s264_s22, %s264_s22, %s265_s23  }
 0x111   :  { %261 = dma.done.wait [#allocation4], 256  }
 0x112   :  { %262 = vsyncadd [#allocation4], 4294967040 }
 0x113   :  { %155 = vsyncpa [#allocation3], 1 }
 0x114   :  { %156 = vsyncpa [#allocation6], 1 }
 0x115   :  { %157 = vsyncpa [#allocation4], 1 }

</bundles_post_ra>
